<compile_context>
chip_gen: v7x
topology: tpu7x:2x2x1
jax: 0.10.0
libtpu: 0.0.40
codegen_flags: <defaults>
</compile_context>

<pallas_src>
import jax
import jax.numpy as jnp
from jax.experimental import pallas as pl
from jax.experimental.pallas import tpu as pltpu

_SUBLANE = 8


def _round_up(x, m):
    return ((x + m - 1) // m) * m


def _vmem_capacity_bytes():
    try:
        return int(pltpu.get_tpu_info().vmem_capacity_bytes)
    except Exception:
        return 64 * 1024 * 1024  # conservative (v7x per-TensorCore VMEM)


# ----------------------------------------------------------------------------
# Kernels: one fused MLP per (tile_b, obs_dim) activation tile. Weights/biases
# are whole-array resident blocks. Matmuls accumulate in f32 on the MXU; the
# bias/ReLU epilogue stays in f32 on the VPU (works on v5e, no bf16 VPU).
# ----------------------------------------------------------------------------
def _mlp2_kernel(x_ref, w1_ref, b1_ref, w2_ref, b2_ref, o_ref):
    x = x_ref[...].astype(w1_ref.dtype)  # in-kernel cast: no extra HBM pass
    h = jnp.dot(x, w1_ref[...], preferred_element_type=jnp.float32)
    h = jnp.maximum(h + b1_ref[...], 0.0)
    y = jnp.dot(h.astype(w2_ref.dtype), w2_ref[...],
                preferred_element_type=jnp.float32)
    o_ref[...] = (y + b2_ref[...]).astype(o_ref.dtype)


def _mlp3_kernel(x_ref, w1_ref, b1_ref, wm_ref, bm_ref, w2_ref, b2_ref, o_ref):
    x = x_ref[...].astype(w1_ref.dtype)
    h = jnp.dot(x, w1_ref[...], preferred_element_type=jnp.float32)
    h = jnp.maximum(h + b1_ref[...], 0.0)
    h = jnp.dot(h.astype(wm_ref.dtype), wm_ref[...],
                preferred_element_type=jnp.float32)
    h = jnp.maximum(h + bm_ref[...], 0.0)
    y = jnp.dot(h.astype(w2_ref.dtype), w2_ref[...],
                preferred_element_type=jnp.float32)
    o_ref[...] = (y + b2_ref[...]).astype(o_ref.dtype)


# ----------------------------------------------------------------------------
# Param preparation (do ONCE, outside the per-step hot path)
# ----------------------------------------------------------------------------
def prepare_params(params, extra_layer=False, compute_dtype=jnp.float32):
    """Cast weights to the MXU compute dtype (bf16 recommended on all TPU
    generations for RND; f32 keeps exact PyTorch-forward numerics). Biases stay
    f32 for the VPU epilogue."""
    out = {
        "w1": params["w1"].astype(compute_dtype),
        "b1": params["b1"].astype(jnp.float32).reshape(1, -1),
        "w2": params["w2"].astype(compute_dtype),
        "b2": params["b2"].astype(jnp.float32).reshape(1, -1),
    }
    if extra_layer:
        out["wm"] = params["wm"].astype(compute_dtype)
        out["bm"] = params["bm"].astype(jnp.float32).reshape(1, -1)
    return out


# ----------------------------------------------------------------------------
# Wrapper (hot path: no pad / cast / slice passes — just reshape + pallas_call)
# ----------------------------------------------------------------------------
def random_feature_network(image, params, extra_layer=False,
                           max_tile_b=4096, vmem_budget_bytes=None):
    """image: [B, *feature_dims] -> flattened to [B, obs_dim] (matches the
    PyTorch reshape). `params` should come from prepare_params()."""
    b = image.shape[0]
    x = image.reshape(b, -1)            # metadata-only reshape
    obs_dim = x.shape[1]
    hidden = params["w1"].shape[1]
    out_dim = params["w2"].shape[1]

    # Biases as (1, out) rows (reshape is free).
    b1 = params["b1"].reshape(1, -1)
    b2 = params["b2"].reshape(1, -1)

    x_bytes = x.dtype.itemsize
    w_bytes = params["w1"].dtype.itemsize
    n_weight_elems = (params["w1"].size + params["w2"].size
                      + (params["wm"].size if extra_layer else 0))
    n_bias_elems = hidden * (2 if extra_layer else 1) + out_dim

    if vmem_budget_bytes is None:
        vmem_budget_bytes = int(0.8 * _vmem_capacity_bytes())

    def working_set(tile_b):
        # Pallas double-buffers EVERY input/output BlockSpec (including the
        # "resident" weight blocks whose index never changes) -> count 2x.
        acts = 2 * tile_b * obs_dim * x_bytes + 2 * tile_b * out_dim * 4
        weights = 2 * n_weight_elems * w_bytes + 2 * n_bias_elems * 4
        inter = (tile_b * hidden * 4 * (2 if extra_layer else 1)
                 + tile_b * out_dim * 4)
        return acts + weights + inter

    # Batch tile: as large as the VMEM budget allows (fewer grid steps, bigger
    # DMAs), clamped to the actual batch. Multi-tile case needs an 8-row
    # (sublane) multiple; a single full-dim block may be any size.
    tile_b = min(b, max_tile_b)
    if tile_b < b:
        tile_b = _round_up(tile_b, _SUBLANE)
    while tile_b > _SUBLANE and working_set(tile_b) > vmem_budget_bytes:
        tile_b = max(_SUBLANE, _round_up(tile_b // 2, _SUBLANE))

    grid = (pl.cdiv(b, tile_b),)        # ragged last tile handled by Pallas

    x_spec = pl.BlockSpec((tile_b, obs_dim), lambda i: (i, 0))
    o_spec = pl.BlockSpec((tile_b, out_dim), lambda i: (i, 0))

    def resident(arr):
        # Whole array as a single block; same block every grid step -> stays
        # resident in VMEM across the batch loop.
        return pl.BlockSpec(arr.shape, lambda i: (0, 0))

    if extra_layer:
        kernel = _mlp3_kernel
        args = (x, params["w1"], b1, params["wm"],
                params["bm"].reshape(1, -1), params["w2"], b2)
        layer_flops = obs_dim * hidden + hidden * hidden + hidden * out_dim
    else:
        kernel = _mlp2_kernel
        args = (x, params["w1"], b1, params["w2"], b2)
        layer_flops = obs_dim * hidden + hidden * out_dim

    # Cost estimate from true (unpadded) dims and actual bytes moved.
    flops = 2 * b * layer_flops
    bytes_accessed = (x.size * x_bytes
                      + n_weight_elems * w_bytes + n_bias_elems * 4
                      + b * out_dim * 4)
    vmem_limit = int(min(_vmem_capacity_bytes(),
                         max(vmem_budget_bytes, 32 * 1024 * 1024)))

    return pl.pallas_call(
        kernel,
        out_shape=jax.ShapeDtypeStruct((b, out_dim), jnp.float32),
        grid=grid,
        in_specs=[x_spec] + [resident(a) for a in args[1:]],
        out_specs=o_spec,
        compiler_params=pltpu.CompilerParams(
            dimension_semantics=("parallel",),
            vmem_limit_bytes=vmem_limit),
        cost_estimate=pl.CostEstimate(
            flops=flops, transcendentals=0, bytes_accessed=bytes_accessed),
    )(*args)


# ----------------------------------------------------------------------------
# Params + pure-JAX reference
# ----------------------------------------------------------------------------
def init_params(key, obs_dim, hidden, out_dim, extra_layer=False):
    """PyTorch-Linear-style init; weights stored [in, out], biases [1, out]."""
    def linear(k, fan_in, fan_out):
        kw, kb = jax.random.split(k)
        bound = 1.0 / jnp.sqrt(float(fan_in))
        w = jax.random.uniform(kw, (fan_in, fan_out), jnp.float32, -bound, bound)
        bb = jax.random.uniform(kb, (1, fan_out), jnp.float32, -bound, bound)
        return w, bb

    keys = jax.random.split(key, 3)
    params = {}
    params["w1"], params["b1"] = linear(keys[0], obs_dim, hidden)
    if extra_layer:
        params["wm"], params["bm"] = linear(keys[1], hidden, hidden)
    params["w2"], params["b2"] = linear(keys[2], hidden, out_dim)
    return params


def reference_forward(image, params, extra_layer=False):
    x = image.reshape(image.shape[0], -1)
    h = jnp.maximum(x @ params["w1"] + params["b1"], 0.0)
    if extra_layer:
        h = jnp.maximum(h @ params["wm"] + params["bm"], 0.0)
    return h @ params["w2"] + params["b2"]


if __name__ == "__main__":
    key = jax.random.PRNGKey(0)
    k_img, k_par, k_img2, k_par2, k_img3 = jax.random.split(key, 5)

    # obs_space = {'image': (32,)} -> obs_dim = 32
    batch, obs_dim = 8, 32
    hidden, out_emb = 64, 16

    # --- f32 path (exact forward semantics), no extra layer ---
    image = jax.random.normal(k_img, (batch, obs_dim), dtype=jnp.float32)
    raw = init_params(k_par, obs_dim, hidden, out_emb, extra_layer=False)
    p32 = prepare_params(raw, extra_layer=False, compute_dtype=jnp.float32)
    y = random_feature_network(image, p32, extra_layer=False)
    y = jax.block_until_ready(y)
    y_ref = reference_forward(image, raw, extra_layer=False)
    assert y.shape == (batch, out_emb)
    assert jnp.allclose(y, y_ref, atol=1e-5, rtol=1e-5)

    # --- bf16-weight / f32-accumulate path (recommended on v5e/v6e/v7x),
    #     extra layer, non-multiple-of-8 batch ---
    batch2 = 10
    image2 = jax.random.normal(k_img2, (batch2, obs_dim), dtype=jnp.float32)
    raw2 = init_params(k_par2, obs_dim, hidden, out_emb, extra_layer=True)
    pbf = prepare_params(raw2, extra_layer=True, compute_dtype=jnp.bfloat16)
    y2 = random_feature_network(image2, pbf, extra_layer=True)
    y2 = jax.block_until_ready(y2)
    y2_ref = reference_forward(image2, raw2, extra_layer=True)
    assert y2.shape == (batch2, out_emb)
    assert jnp.allclose(y2, y2_ref, atol=2e-2, rtol=2e-2)

    # --- ragged multi-tile path: batch=20 with a forced tile of 8 rows
    #     (grid = cdiv(20, 8) = 3, last tile partial) ---
    batch3 = 20
    image3 = jax.random.normal(k_img3, (batch3, obs_dim), dtype=jnp.float32)
    y3 = random_feature_network(image3, p32, extra_layer=False, max_tile_b=8)
    y3 = jax.block_until_ready(y3)
    y3_ref = reference_forward(image3, raw, extra_layer=False)
    assert y3.shape == (batch3, out_emb)
    assert jnp.allclose(y3, y3_ref, atol=1e-5, rtol=1e-5)

    print("KERNEL_OK")
</pallas_src>

<mosaic_0001>
module attributes {stable_mosaic.version = 11 : i64} {
  func.func @_mlp2_kernel(%arg0: i32, %arg1: memref<8x32xf32, #tpu.memory_space<vmem>>, %arg2: memref<32x64xf32, #tpu.memory_space<vmem>>, %arg3: memref<1x64xf32, #tpu.memory_space<vmem>>, %arg4: memref<64x16xf32, #tpu.memory_space<vmem>>, %arg5: memref<1x16xf32, #tpu.memory_space<vmem>>, %arg6: memref<8x16xf32, #tpu.memory_space<vmem>>) attributes {dimension_semantics = [#tpu.dimension_semantics<parallel>], iteration_bounds = array<i64: 1>, scalar_prefetch = 0 : i64, scratch_operands = 0 : i64, tpu.core_type = #tpu.core_type<tc>, window_params = [{transform_indices = @transform_0, window_bounds = array<i64: 8, 32>}, {pipeline_mode = #tpu.pipeline_mode<synchronous>, transform_indices = @transform_1, window_bounds = array<i64: 32, 64>}, {pipeline_mode = #tpu.pipeline_mode<synchronous>, transform_indices = @transform_2, window_bounds = array<i64: 1, 64>}, {pipeline_mode = #tpu.pipeline_mode<synchronous>, transform_indices = @transform_3, window_bounds = array<i64: 64, 16>}, {pipeline_mode = #tpu.pipeline_mode<synchronous>, transform_indices = @transform_4, window_bounds = array<i64: 1, 16>}, {transform_indices = @transform_5, window_bounds = array<i64: 8, 16>}]} {
    %c0 = arith.constant 0 : index
    %c0_0 = arith.constant 0 : index
    %0 = vector.load %arg1[%c0, %c0_0] : memref<8x32xf32, #tpu.memory_space<vmem>>, vector<8x32xf32>
    %c0_1 = arith.constant 0 : index
    %c0_2 = arith.constant 0 : index
    %1 = vector.load %arg2[%c0_1, %c0_2] : memref<32x64xf32, #tpu.memory_space<vmem>>, vector<32x64xf32>
    %cst = arith.constant dense<0.000000e+00> : vector<8x64xf32>
    %2 = tpu.matmul %0, %1, %cst {dimension_numbers = #tpu.dot_dimension_numbers<[1], [0], [0], [1], [0, 0, 1, 1], [], []>} : vector<8x32xf32>, vector<32x64xf32>, vector<8x64xf32> -> vector<8x64xf32>
    %c0_3 = arith.constant 0 : index
    %c0_4 = arith.constant 0 : index
    %3 = vector.load %arg3[%c0_3, %c0_4] : memref<1x64xf32, #tpu.memory_space<vmem>>, vector<1x64xf32>
    %4 = vector.broadcast %3 : vector<1x64xf32> to vector<8x64xf32>
    %5 = arith.addf %2, %4 : vector<8x64xf32>
    %cst_5 = arith.constant 0.000000e+00 : f32
    %6 = vector.broadcast %cst_5 : f32 to vector<8x64xf32>
    %7 = arith.maximumf %5, %6 : vector<8x64xf32>
    %c0_6 = arith.constant 0 : index
    %c0_7 = arith.constant 0 : index
    %8 = vector.load %arg4[%c0_6, %c0_7] : memref<64x16xf32, #tpu.memory_space<vmem>>, vector<64x16xf32>
    %cst_8 = arith.constant dense<0.000000e+00> : vector<8x16xf32>
    %9 = tpu.matmul %7, %8, %cst_8 {dimension_numbers = #tpu.dot_dimension_numbers<[1], [0], [0], [1], [0, 0, 1, 1], [], []>} : vector<8x64xf32>, vector<64x16xf32>, vector<8x16xf32> -> vector<8x16xf32>
    %c0_9 = arith.constant 0 : index
    %c0_10 = arith.constant 0 : index
    %10 = vector.load %arg5[%c0_9, %c0_10] : memref<1x16xf32, #tpu.memory_space<vmem>>, vector<1x16xf32>
    %11 = vector.broadcast %10 : vector<1x16xf32> to vector<8x16xf32>
    %12 = arith.addf %9, %11 : vector<8x16xf32>
    %c0_11 = arith.constant 0 : index
    %c0_12 = arith.constant 0 : index
    %13 = vector.load %arg6[%c0_11, %c0_12] : memref<8x16xf32, #tpu.memory_space<vmem>>, vector<8x16xf32>
    tpu.vector_store %arg6[%c0_11, %c0_12], %12 {strides = array<i32>} : memref<8x16xf32, #tpu.memory_space<vmem>>, vector<8x16xf32>,
    return
  }
  func.func @transform_0(%arg0: i32) -> (i32, i32) {
    %c0_i32 = arith.constant 0 : i32
    %c0_i32_0 = arith.constant 0 : i32
    return %arg0, %c0_i32 : i32, i32
  }
  func.func @transform_1(%arg0: i32) -> (i32, i32) {
    %c0_i32 = arith.constant 0 : i32
    %c0_i32_0 = arith.constant 0 : i32
    %c0_i32_1 = arith.constant 0 : i32
    return %c0_i32, %c0_i32_0 : i32, i32
  }
  func.func @transform_2(%arg0: i32) -> (i32, i32) {
    %c0_i32 = arith.constant 0 : i32
    %c0_i32_0 = arith.constant 0 : i32
    %c0_i32_1 = arith.constant 0 : i32
    return %c0_i32, %c0_i32_0 : i32, i32
  }
  func.func @transform_3(%arg0: i32) -> (i32, i32) {
    %c0_i32 = arith.constant 0 : i32
    %c0_i32_0 = arith.constant 0 : i32
    %c0_i32_1 = arith.constant 0 : i32
    return %c0_i32, %c0_i32_0 : i32, i32
  }
  func.func @transform_4(%arg0: i32) -> (i32, i32) {
    %c0_i32 = arith.constant 0 : i32
    %c0_i32_0 = arith.constant 0 : i32
    %c0_i32_1 = arith.constant 0 : i32
    return %c0_i32, %c0_i32_0 : i32, i32
  }
  func.func @transform_5(%arg0: i32) -> (i32, i32) {
    %c0_i32 = arith.constant 0 : i32
    %c0_i32_0 = arith.constant 0 : i32
    return %arg0, %c0_i32 : i32, i32
  }
}

</mosaic_0001>

<bundles_post_ra>
// kernel: tpu_custom_call.1
= control target key start
LH: loop header
LB: loop body
LE: loop exit
PB: predicated region body
PF: predicated region fallthrough
CT: control target
= control target key end

     0   :  { %v307_v3 = vmov 0.0|0.0   ;;  %vm308_vm0 = vmmov 0   ;;  %v309_v6 = vmov 0.0   ;;  %s398_s0 = inlined_call_operand.vmem [shape: f32[8,32], index: 0, kind: input, shape index: {}]   ;;  %s399_s1 = inlined_call_operand.vmem [shape: f32[32,64], index: 1, kind: input, shape index: {}]   ;;  %s400_s2 = inlined_call_operand.vmem [shape: f32[1,64], index: 2, kind: input, shape index: {}]   ;;  %s401_s3 = inlined_call_operand.vmem [shape: f32[64,16], index: 3, kind: input, shape index: {}]   ;;  %s402_s4 = inlined_call_operand.vmem [shape: f32[1,16], index: 4, kind: input, shape index: {}]   ;;  %s403_s5 = inlined_call_operand.hbm [shape: f32[8,16], index: 5, kind: output, shape index: {}]  }
   0x1   :  { %v22_v0 = vld [vmem:[%s399_s1] sm:$0xff]  ;;  %v23_v1 = vld [vmem:[%s399_s1 + $0x8] sm:$0xff]  ;;  %v24_v2 = vld [vmem:[%s399_s1 + $0x10] sm:$0xff]  ;;  %261 = vmatprep.subr.bf16.mxu0 %v307_v3  ;;  %239 = vmatprep.mubr.msk.f32.mxu0 %vm308_vm0, %v309_v6 }
   0x2   :  { %v262_v4 = vpack.c.bf16 %v23_v1, %v22_v0  ;;  %v25_v5 = vld [vmem:[%s399_s1 + $0x18] sm:$0xff]  ;;  %v108_v7 = vld [vmem:[%s401_s3] sm:$0xff]  ;;  %267 = vmatprep.subr.bf16.mxu1 %v307_v3  ;;  %v109_v8 = vld [vmem:[%s401_s3 + $0x8] sm:$0xff]  ;;  %258 = vmatprep.mubr.msk.f32.mxu1 %vm308_vm0, %v309_v6 }
   0x3   :  { %v110_v9 = vld [vmem:[%s401_s3 + $0x10] sm:$0xff]  ;;  %v111_v10 = vld [vmem:[%s401_s3 + $0x18] sm:$0xff]  ;;  %v265_v11 = vpack.c.bf16 %v25_v5, %v24_v2  ;;  %v268_v12 = vpack.c.bf16 %v109_v8, %v108_v7 }
   0x4   :  { %263 = vmatpush3.bf16.msra.mxu0 %v262_v4 }
   0x5   :  { %264 = vmatprep.subr.bf16.mxu0 %v307_v3 }
   0x6   :  { %10 = vsyncpa [#allocation3], 0  ;;  %269 = vmatpush3.bf16.msra.mxu1 %v268_v12  ;;  %v271_v13 = vpack.c.bf16 %v111_v10, %v110_v9  ;;  %v112_v14 = vld [vmem:[%s401_s3 + $0x20] sm:$0xff]  ;;  %v113_v15 = vld [vmem:[%s401_s3 + $0x28] sm:$0xff]  ;;  %vm33_vm1 = vcmask 261120   ;;  %vm123_vm2 = vcmask 523264  }
   0x7   :  { %270 = vmatprep.subr.bf16.mxu1 %v307_v3  ;;  %v21_v16 = vld [vmem:[%s398_s0] sm:$0xff]  ;;  %v274_v17 = vpack.c.bf16 %v113_v15, %v112_v14  ;;  %v114_v18 = vld [vmem:[%s401_s3 + $0x30] sm:$0xff]  ;;  %v115_v19 = vld [vmem:[%s401_s3 + $0x38] sm:$0xff]  ;;  %s310_s21 = smov [#allocation2]   ;;  %vm197_vm3 = vcmask 130048  }
   0x8   :  { %266 = vmatpush3.bf16.msra.mxu0 %v265_v11  ;;  %v277_v20 = vpack.c.bf16 %v115_v19, %v114_v18  ;;  %v213_v21 = vld [vmem:[%s400_s2] ss:$0 sm:$0xff]  ;;  %s205_s22 = sshll.u32 %s310_s21, 4  ;;  %s206_s22 = int_to_ptr.vmem [resolvable:$true] %s205_s22 }
   0x9   :  { %v215_v26 = vld [vmem:[%s402_s4] ss:$0 sm:$0xff]  ;;  %s283_s3 = scalar_lea.vmem %s206_s22, 128  ;;  %p288_p1 = scmp.lt.s32.totalorder %s206_s22, %s206_s22 }
   0xa   :  { %272 = vmatpush3.bf16.msra.mxu1 %v271_v13  ;;  %p284_p0 = scmp.ne.s32.totalorder %s206_s22, %s283_s3  ;;  %p289_p2 = scmp.lt.s32.totalorder %s283_s3, %s283_s3 }
   0xb   :  { %240 = vmatmul.mubr.msk.f32.vlgmr.msra.gmra.mrb[0].mxu0 %vm33_vm1, %v21_v16  ;;  %273 = vmatprep.subr.bf16.mxu1 %v307_v3 }
   0xc   :  { %p290_p3 = por %p289_p2, %p288_p1 }
   0xe   :  { %275 = vmatpush3.bf16.msra.mxu1 %v274_v17  ;;  %p291_p4 = pnand %p290_p3, %p284_p0 }
   0xf   :  { %276 = vmatprep.subr.bf16.mxu1 %v307_v3 }
  0x12   :  { %278 = vmatpush3.bf16.msra.mxu1 %v277_v20 }
  0xde   :  { %v103_v22 = vpop.f32.mrb[0].mxu0 }
  0xdf   :  { %v104_v23 = vadd.f32 %v213_v21, %v103_v22  ;;  %v241_v24 = vpop.f32.mrb[1].mxu0 }
  0xe1   :  { %v107_v25 = vmax.f32 %v104_v23, 0.0 }
  0xe3   :  { %259 = vmatmul.mubr.msk.f32.vlgmr.msra.gmra.mrb[0].mxu1 %vm123_vm2, %v107_v25 }
 0x1b6   :  { %v193_v27 = vpop.f32.mrb[0].mxu1 }
 0x1b7   :  { %v194_v28 = vadd.f32 %v215_v26, %v193_v27  ;;  %v260_v29 = vpop.f32.mrb[1].mxu1 }
 0x1b9   :  { %198 = vst.msk [vmem:[#allocation2] sm:$0xff] %vm197_vm3, %v194_v28 }
 0x1ba   :  { %294 = shalt.err (!%p291_p4)
}
 0x1bb   :  { %s295_s24 = scalar_lea.hbm %s403_s5, 128 }
 0x1bc   :  { %p296_p5 = scmp.ne.s32.totalorder %s403_s5, %s295_s24  ;;  %p299_p6 = scmp.lt.u32.totalorder %s295_s24, %s403_s5 }
 0x1be   :  { %p301_p7 = pnand %p299_p6, %p296_p5 }
 0x1c0   :  { %304 = shalt.err (!%p301_p7)
}
 0x1c1   :  { %208 = dma.vmem_to_hbm [thread:$0]  %s206_s22, 128, %s403_s5, [#allocation3]  }
 0x1c2   :  { %305 = dma.done.wait [#allocation3], 128  }
 0x1c3   :  { %306 = vsyncadd [#allocation3], 4294967168 }
 0x1c4   :  { %212 = vsyncpa [#allocation3], 1 }

</bundles_post_ra>
